<compile_context>
chip_gen: v7x
topology: tpu7x:2x2x1
jax: 0.10.0
libtpu: 0.0.40
codegen_flags: <defaults>
</compile_context>

<pallas_src>
import functools
import math

import jax
import jax.numpy as jnp
from jax.experimental import pallas as pl
from jax.experimental.pallas import tpu as pltpu


def _round_up(x, m):
    return ((x + m - 1) // m) * m


def _device_kind():
    try:
        return jax.devices()[0].device_kind.lower()
    except Exception:  # pragma: no cover - defensive
        return ""


# ---------------------------------------------------------------------------
# Prep kernel (row-tiled): L2-normalize rows and fold 1/sqrt(T).  O(N*D).
# ---------------------------------------------------------------------------
def _prep_kernel(feat_ref, fn_ref, *, inv_sqrt_t):
    f = feat_ref[...].astype(jnp.float32)                 # (tmp, D_pad)
    ss = jnp.sum(f * f, axis=1, keepdims=True)
    # torch F.normalize: x / max(||x||, 1e-12)  ==  x * rsqrt(max(||x||^2, 1e-24)).
    # rsqrt runs on the EUP; the temperature scale is folded in for free.
    inv = jax.lax.rsqrt(jnp.maximum(ss, 1e-24)) * inv_sqrt_t
    fn_ref[...] = (f * inv).astype(fn_ref.dtype)          # padded rows stay exactly 0


# ---------------------------------------------------------------------------
# Main kernel: tiled similarity + fixed-max log-sum-exp (no online max).
# ---------------------------------------------------------------------------
def _lse_kernel(lhs_ref, rhs_ref, pos_ref, loss_ref, l_ref, *,
                n_valid, tm, tn, n_col_tiles, fixed_max, has_pad, exp_dtype):
    i = pl.program_id(0)        # query-row tile   (parallel / core-parallel)
    j = pl.program_id(1)        # key-column tile  (arbitrary, innermost)

    @pl.when(j == 0)
    def _():
        l_ref[...] = jnp.zeros_like(l_ref)

    # Similarity tile straight off the MXU (operands already carry 1/sqrt(T),
    # so this is z = sim / T); f32 accumulation.  No VMEM staging scratch.
    z = jax.lax.dot_general(
        lhs_ref[...], rhs_ref[...], (((1,), (1,)), ((), ())),
        preferred_element_type=jnp.float32)

    # Fixed max: z <= 1/T (up to bf16 rounding), so exp(z - 1/T) never
    # overflows and no running max / rescale is needed.
    zm = z - fixed_max
    if jnp.dtype(exp_dtype) == jnp.dtype(jnp.float32):
        ez = jnp.exp(zm)
    else:
        # bf16 EUP exp (v6e/v7x); accumulate in f32.
        ez = jnp.exp(zm.astype(exp_dtype)).astype(jnp.float32)

    def accumulate(e):
        # Lane-partial sums: VPU adds per 128-lane column chunk; the single
        # cross-lane (XLU) reduce is deferred to finalize.
        acc = l_ref[...]
        for c in range(tn // 128):
            acc = acc + e[:, c * 128:(c + 1) * 128]
        l_ref[...] = acc

    row0 = i * tm
    col0 = j * tn
    diag = jnp.logical_and(row0 < col0 + tn, col0 < row0 + tm)
    needs_mask = jnp.logical_or(diag, col0 + tn > n_valid) if has_pad else diag

    @pl.when(jnp.logical_not(needs_mask))
    def _():
        accumulate(ez)

    @pl.when(needs_mask)
    def _():
        rowg = row0 + jax.lax.broadcasted_iota(jnp.int32, (tm, tn), 0)
        colg = col0 + jax.lax.broadcasted_iota(jnp.int32, (tm, tn), 1)
        keep = rowg != colg                         # drop the diagonal
        if has_pad:
            keep = jnp.logical_and(keep, colg < n_valid)   # drop padded keys
        accumulate(jnp.where(keep, ez, 0.0))

    @pl.when(j == n_col_tiles - 1)
    def _():
        row_l = jnp.sum(l_ref[...], axis=1, keepdims=True)   # one XLU reduce
        lse = fixed_max + jnp.log(row_l)                      # (tm, 1)
        per_row = lse - pos_ref[...]                          # CE per row
        # Lane-dense (tm, 128) store; final mean over valid rows is plain JAX.
        loss_ref[...] = jnp.broadcast_to(per_row, loss_ref.shape)


# ---------------------------------------------------------------------------
# Wrapper.
# ---------------------------------------------------------------------------
def contrastive_loss(features, *, batch_size, n_views=2, temperature=0.5,
                     compute_dtype=jnp.bfloat16, tile_m=512, tile_n=256,
                     exp_dtype=None):
    """features: (batch_size * n_views, D).  Returns scalar InfoNCE loss."""
    assert n_views == 2, "forward() hardcodes batch_size * 2 (n_views == 2)"
    assert tile_m % 128 == 0 and tile_n % 128 == 0
    features = jnp.asarray(features, jnp.float32)
    n, d = features.shape
    assert n == batch_size * n_views

    # ---- layout plumbing (no FLOPs hoisted out of Pallas) ----
    d_pad = _round_up(d, 128)                 # lane / MXU contraction alignment
    n128 = _round_up(n, 128)
    tm = min(tile_m, n128)                    # sublane dim of sim tile / output
    tn = min(tile_n, n128)                    # lane dim of sim tile (mult. of 128)
    n_pad = _round_up(n, math.lcm(tm, tn))

    kind = _device_kind()
    if exp_dtype is None:
        use_bf16_exp = (jnp.dtype(compute_dtype) == jnp.dtype(jnp.bfloat16)
                        and ("v6" in kind or "v7" in kind))  # not on v5e
        exp_dtype = jnp.bfloat16 if use_bf16_exp else jnp.float32

    feat = jnp.pad(features, ((0, n_pad - n), (0, d_pad - d)))

    # ---- prep kernel: row-tiled normalize + temperature fold ----
    tmp = 256 if tm % 256 == 0 else 128
    fn_scaled = pl.pallas_call(
        functools.partial(_prep_kernel,
                          inv_sqrt_t=float(1.0 / math.sqrt(temperature))),
        out_shape=jax.ShapeDtypeStruct((n_pad, d_pad), compute_dtype),
        grid_spec=pltpu.PrefetchScalarGridSpec(
            num_scalar_prefetch=0,
            grid=(n_pad // tmp,),
            in_specs=[pl.BlockSpec((tmp, d_pad), lambda i: (i, 0))],
            out_specs=pl.BlockSpec((tmp, d_pad), lambda i: (i, 0))),
        compiler_params=pltpu.CompilerParams(dimension_semantics=("parallel",)),
    )(feat)

    # Positive logit per row: tiny O(N*D) einsum on the already-normalized,
    # temperature-folded operands (same dtype path as the MXU similarities).
    fn_valid = fn_scaled[:n]
    pos = jnp.einsum("nd,nd->n", fn_valid,
                     jnp.roll(fn_valid, -batch_size, axis=0),
                     preferred_element_type=jnp.float32)
    pos = jnp.pad(pos, (0, n_pad - n)).reshape(n_pad, 1)

    # ---- main tiled LSE kernel ----
    n_row_tiles = n_pad // tm
    n_col_tiles = n_pad // tn

    if "v7" in kind and n_row_tiles % 2 == 0:
        # Shard the independent row-tile axis across the two v7x TensorCores.
        dim_sem = (pltpu.CORE_PARALLEL, pltpu.ARBITRARY)
    else:
        dim_sem = ("parallel", "arbitrary")

    itemsize = jnp.dtype(compute_dtype).itemsize
    cost = pl.CostEstimate(
        flops=2 * n_pad * n_pad * d_pad,
        transcendentals=n_pad * n_pad,
        bytes_accessed=(n_pad * d_pad * itemsize               # lhs (resident per row tile)
                        + n_row_tiles * n_pad * d_pad * itemsize  # rhs streamed per row tile
                        + n_pad * 4                             # positives
                        + n_pad * 128 * 4))                     # per-row loss slab

    kernel = functools.partial(
        _lse_kernel, n_valid=n, tm=tm, tn=tn, n_col_tiles=n_col_tiles,
        fixed_max=float(1.0 / temperature), has_pad=(n_pad != n),
        exp_dtype=exp_dtype)

    per_row = pl.pallas_call(
        kernel,
        out_shape=jax.ShapeDtypeStruct((n_pad, 128), jnp.float32),
        grid_spec=pltpu.PrefetchScalarGridSpec(
            num_scalar_prefetch=0,
            grid=(n_row_tiles, n_col_tiles),
            in_specs=[
                pl.BlockSpec((tm, d_pad), lambda i, j: (i, 0)),  # query rows
                pl.BlockSpec((tn, d_pad), lambda i, j: (j, 0)),  # key rows
                pl.BlockSpec((tm, 1), lambda i, j: (i, 0)),      # positives
            ],
            out_specs=pl.BlockSpec((tm, 128), lambda i, j: (i, 0)),
            scratch_shapes=[
                pltpu.VMEM((tm, 128), jnp.float32),   # lane-partial exp sums
            ]),
        compiler_params=pltpu.CompilerParams(dimension_semantics=dim_sem),
        cost_estimate=cost,
    )(fn_scaled, fn_scaled, pos)

    # Final mean over valid rows (tiny reduction, plain JAX).
    return jnp.mean(per_row[:n, 0])


# ---------------------------------------------------------------------------
# Pure-JAX reference mirroring the PyTorch module (logits=False).
# ---------------------------------------------------------------------------
def _reference_loss(features, *, batch_size, temperature=0.5):
    n = features.shape[0]
    f = features.astype(jnp.float32)
    fn = f / jnp.maximum(jnp.linalg.norm(f, axis=1, keepdims=True), 1e-12)
    sim = fn @ fn.T
    idx = jnp.arange(n)
    z = sim / temperature
    z = jnp.where(idx[:, None] == idx[None, :], -jnp.inf, z)
    lse = jax.scipy.special.logsumexp(z, axis=1)
    pos = sim[idx, (idx + batch_size) % n] / temperature
    return jnp.mean(lse - pos)


# TODO(synk): logits=True path (returning the full (N, N-1) logits matrix and
# labels) is not implemented; only the mean cross-entropy loss path is.

if __name__ == "__main__":
    batch_size = 4
    n_views = 2
    temperature = 0.5
    feat_dim = 32

    key = jax.random.PRNGKey(0)
    features = jax.random.normal(
        key, (batch_size * n_views, feat_dim), dtype=jnp.float32)

    ref = jax.block_until_ready(
        _reference_loss(features, batch_size=batch_size, temperature=temperature))

    # f32-operand path (f32 exp): tight check against the reference.
    loss_f32 = jax.block_until_ready(contrastive_loss(
        features, batch_size=batch_size, n_views=n_views,
        temperature=temperature, compute_dtype=jnp.float32))
    assert jnp.allclose(loss_f32, ref, atol=1e-4, rtol=1e-4), (loss_f32, ref)

    # Default bf16-operand / f32-accumulate MXU path (bf16 exp on v6e/v7x):
    # loosened tolerance.
    loss_bf16 = jax.block_until_ready(contrastive_loss(
        features, batch_size=batch_size, n_views=n_views,
        temperature=temperature))
    assert jnp.allclose(loss_bf16, ref, atol=5e-2, rtol=5e-2), (loss_bf16, ref)

    print("KERNEL_OK")
</pallas_src>

<mosaic_0001>
module attributes {stable_mosaic.version = 11 : i64} {
  func.func @_prep_kernel(%arg0: i32, %arg1: memref<128x128xf32, #tpu.memory_space<vmem>>, %arg2: memref<128x128xf32, #tpu.memory_space<vmem>>) attributes {dimension_semantics = [#tpu.dimension_semantics<parallel>], iteration_bounds = array<i64: 1>, scalar_prefetch = 0 : i64, scratch_operands = 0 : i64, tpu.core_type = #tpu.core_type<tc>, window_params = [{transform_indices = @transform_0, window_bounds = array<i64: 128, 128>}, {transform_indices = @transform_1, window_bounds = array<i64: 128, 128>}]} {
    %c0 = arith.constant 0 : index
    %c0_0 = arith.constant 0 : index
    %0 = vector.load %arg1[%c0, %c0_0] : memref<128x128xf32, #tpu.memory_space<vmem>>, vector<128x128xf32>
    %1 = arith.mulf %0, %0 : vector<128x128xf32>
    %cst = arith.constant dense<0.000000e+00> : vector<128xf32>
    %2 = vector.multi_reduction <add>, %1, %cst [1] : vector<128x128xf32> to vector<128xf32>
    %3 = vector.shape_cast %2 : vector<128xf32> to vector<128x1xf32>
    %cst_1 = arith.constant 1.000000e-24 : f32
    %4 = vector.broadcast %cst_1 : f32 to vector<128x1xf32>
    %5 = arith.maximumf %3, %4 : vector<128x1xf32>
    %6 = math.rsqrt %5 : vector<128x1xf32>
    %cst_2 = arith.constant 1.41421354 : f32
    %7 = vector.broadcast %cst_2 : f32 to vector<128x1xf32>
    %8 = arith.mulf %6, %7 : vector<128x1xf32>
    %9 = vector.broadcast %8 : vector<128x1xf32> to vector<128x128xf32>
    %10 = arith.mulf %0, %9 : vector<128x128xf32>
    %c0_3 = arith.constant 0 : index
    %c0_4 = arith.constant 0 : index
    %11 = vector.load %arg2[%c0_3, %c0_4] : memref<128x128xf32, #tpu.memory_space<vmem>>, vector<128x128xf32>
    tpu.vector_store %arg2[%c0_3, %c0_4], %10 {strides = array<i32>} : memref<128x128xf32, #tpu.memory_space<vmem>>, vector<128x128xf32>,
    return
  }
  func.func @transform_0(%arg0: i32) -> (i32, i32) {
    %c0_i32 = arith.constant 0 : i32
    %c0_i32_0 = arith.constant 0 : i32
    return %arg0, %c0_i32 : i32, i32
  }
  func.func @transform_1(%arg0: i32) -> (i32, i32) {
    %c0_i32 = arith.constant 0 : i32
    %c0_i32_0 = arith.constant 0 : i32
    return %arg0, %c0_i32 : i32, i32
  }
}

</mosaic_0001>

<bundles_post_ra>
// kernel: tpu_custom_call.1
= control target key start
LH: loop header
LB: loop body
LE: loop exit
PB: predicated region body
PF: predicated region fallthrough
CT: control target
= control target key end

     0   :  { %6 = vsyncpa [#allocation3], 0  ;;  %s392_s0 = inlined_call_operand.hbm [shape: f32[128,128], index: 0, kind: input, shape index: {}]   ;;  %s393_s1 = inlined_call_operand.hbm [shape: f32[128,128], index: 1, kind: output, shape index: {}]  }
   0x1   :  { %7 = vsyncpa [#allocation4], 0  ;;  %s268_s6 = smov [#allocation2]   ;;  %s220_s10 = scalar_lea.hbm %s392_s0, 2048 }
   0x2   :  { %s13_s7 = sshll.u32 %s268_s6, 4  ;;  %p221_p0 = scmp.ne.s32.totalorder %s392_s0, %s220_s10  ;;  %s14_s7 = int_to_ptr.vmem [resolvable:$true] %s13_s7 }
   0x3   :  { %p224_p1 = scmp.lt.u32.totalorder %s220_s10, %s392_s0 }
   0x5   :  { %p226_p2 = pnand %p224_p1, %p221_p0 }
   0x7   :  { %229 = shalt.err (!%p226_p2)
}
   0x8   :  { %s230_s15 = scalar_lea.vmem %s14_s7, 2048  ;;  %p235_p4 = scmp.lt.s32.totalorder %s14_s7, %s14_s7 }
   0x9   :  { %p231_p3 = scmp.ne.s32.totalorder %s14_s7, %s230_s15  ;;  %p236_p5 = scmp.lt.s32.totalorder %s230_s15, %s230_s15 }
   0xb   :  { %p237_p6 = por %p236_p5, %p235_p4 }
   0xd   :  { %p238_p7 = pnand %p237_p6, %p231_p3 }
   0xf   :  { %241 = shalt.err (!%p238_p7)
}
  0x10   :  { %s269_s16 = smov 128   ;;  %s270_s17 = smov 8  }
  0x11   :  { %19 = dma.hbm_to_vmem [thread:$0]  %s392_s0, 2048, %s14_s7, [#allocation3], %s269_s16, %s269_s16, %s270_s17  }
  0x12   :  { %264 = dma.done.wait [#allocation3], 2048  }
  0x13   :  { %265 = vsyncadd [#allocation3], 4294965248  ;;  %v297_v0 = vld [vmem:[#allocation2 + $0x10] sm:$0xff]  ;;  %v299_v1 = vld [vmem:[#allocation2] sm:$0xff]  ;;  %s271_s0 = smov [#allocation5]  }
  0x14   :  { %v301_v2 = vld [vmem:[#allocation2 + $0x18] sm:$0xff]  ;;  %v41_v3 = vmul.f32 %v297_v0, %v297_v0  ;;  %v39_v4 = vmul.f32 %v299_v1, %v299_v1  ;;  %v307_v5 = vld [vmem:[#allocation2 + $0x8] sm:$0xff]  ;;  %v315_v9 = vld [vmem:[#allocation2 + $0x20] sm:$0xff]  ;;  %s172_s20 = sshll.u32 %s271_s0, 4  ;;  %s173_s20 = int_to_ptr.vmem [resolvable:$true] %s172_s20 }
  0x15   :  { %v42_v6 = vmul.f32 %v301_v2, %v301_v2  ;;  %v40_v7 = vmul.f32 %v307_v5, %v307_v5  ;;  %v313_v8 = vld [vmem:[#allocation2 + $0x28] sm:$0xff]  ;;  %v43_v11 = vmul.f32 %v315_v9, %v315_v9  ;;  %v321_v12 = vld [vmem:[#allocation2 + $0x38] sm:$0xff]  ;;  %v323_v13 = vld [vmem:[#allocation2 + $0x30] sm:$0xff]  ;;  %s242_s21 = scalar_lea.vmem %s173_s20, 2048  ;;  %p247_p9 = scmp.lt.s32.totalorder %s173_s20, %s173_s20 }
  0x16   :  { %59 = vadd.xlane.f32.xlu1 %v41_v3  ;;  %55 = vadd.xlane.f32.xlu0 %v39_v4  ;;  %v44_v10 = vmul.f32 %v313_v8, %v313_v8  ;;  %v46_v14 = vmul.f32 %v321_v12, %v321_v12  ;;  %v45_v15 = vmul.f32 %v323_v13, %v323_v13  ;;  %v329_v16 = vld [vmem:[#allocation2 + $0x48] sm:$0xff]  ;;  %v331_v17 = vld [vmem:[#allocation2 + $0x40] sm:$0xff]  ;;  %v337_v20 = vld [vmem:[#allocation2 + $0x58] sm:$0xff]  ;;  %p243_p8 = scmp.ne.s32.totalorder %s173_s20, %s242_s21  ;;  %p248_p10 = scmp.lt.s32.totalorder %s242_s21, %s242_s21 }
  0x17   :  { %v48_v18 = vmul.f32 %v329_v16, %v329_v16  ;;  %v47_v19 = vmul.f32 %v331_v17, %v331_v17  ;;  %v339_v21 = vld [vmem:[#allocation2 + $0x50] sm:$0xff]  ;;  %v50_v22 = vmul.f32 %v337_v20, %v337_v20  ;;  %v345_v24 = vld [vmem:[#allocation2 + $0x68] sm:$0xff]  ;;  %v347_v25 = vld [vmem:[#allocation2 + $0x60] sm:$0xff] }
  0x18   :  { %v49_v23 = vmul.f32 %v339_v21, %v339_v21  ;;  %v52_v26 = vmul.f32 %v345_v24, %v345_v24  ;;  %v51_v27 = vmul.f32 %v347_v25, %v347_v25  ;;  %v353_v28 = vld [vmem:[#allocation2 + $0x78] sm:$0xff]  ;;  %v355_v29 = vld [vmem:[#allocation2 + $0x70] sm:$0xff]  ;;  %p249_p11 = por %p248_p10, %p247_p9 }
  0x19   :  { %v54_v30 = vmul.f32 %v353_v28, %v353_v28  ;;  %v53_v31 = vmul.f32 %v355_v29, %v355_v29 }
  0x1a   :  { %61 = vadd.xlane.f32.xlu1 %v42_v6  ;;  %57 = vadd.xlane.f32.xlu0 %v40_v7  ;;  %p250_p12 = pnand %p249_p11, %p243_p8 }
  0x1e   :  { %65 = vadd.xlane.f32.xlu1 %v44_v10  ;;  %63 = vadd.xlane.f32.xlu0 %v43_v11 }
  0x22   :  { %69 = vadd.xlane.f32.xlu1 %v46_v14  ;;  %67 = vadd.xlane.f32.xlu0 %v45_v15 }
  0x26   :  { %73 = vadd.xlane.f32.xlu1 %v48_v18  ;;  %71 = vadd.xlane.f32.xlu0 %v47_v19 }
  0x2a   :  { %77 = vadd.xlane.f32.xlu1 %v50_v22  ;;  %75 = vadd.xlane.f32.xlu0 %v49_v23 }
  0x2e   :  { %81 = vadd.xlane.f32.xlu1 %v52_v26  ;;  %79 = vadd.xlane.f32.xlu0 %v51_v27 }
  0x32   :  { %85 = vadd.xlane.f32.xlu1 %v54_v30  ;;  %83 = vadd.xlane.f32.xlu0 %v53_v31 }
  0xa3   :  { %v60_v32 = vpop.xlane.xlu1 %59  ;;  %v56_v33 = vpop.xlane.xlu0 %55 }
  0xa4   :  { %v89_v34 = vmax.f32 %v60_v32, 1e-24  ;;  %v87_v35 = vmax.f32 %v56_v33, 1e-24 }
  0xa6   :  { %188 = vrsqrt.f32 %v89_v34 }
  0xa7   :  { %190 = vrsqrt.f32 %v87_v35  ;;  %v62_v36 = vpop.xlane.xlu1 %61  ;;  %v58_v37 = vpop.xlane.xlu0 %57 }
  0xa8   :  { %v90_v38 = vmax.f32 %v62_v36, 1e-24  ;;  %v88_v39 = vmax.f32 %v58_v37, 1e-24 }
  0xaa   :  { %192 = vrsqrt.f32 %v90_v38 }
  0xab   :  { %194 = vrsqrt.f32 %v88_v39  ;;  %v66_v40 = vpop.xlane.xlu1 %65  ;;  %v64_v41 = vpop.xlane.xlu0 %63 }
  0xac   :  { %v92_v42 = vmax.f32 %v66_v40, 1e-24  ;;  %v91_v43 = vmax.f32 %v64_v41, 1e-24 }
  0xae   :  { %196 = vrsqrt.f32 %v92_v42 }
  0xaf   :  { %198 = vrsqrt.f32 %v91_v43  ;;  %v70_v44 = vpop.xlane.xlu1 %69  ;;  %v68_v45 = vpop.xlane.xlu0 %67 }
  0xb0   :  { %v189_v46 = vpop.eup %188  ;;  %v94_v47 = vmax.f32 %v70_v44, 1e-24  ;;  %v93_v48 = vmax.f32 %v68_v45, 1e-24 }
  0xb1   :  { %v191_v49 = vpop.eup %190  ;;  %v121_v50 = vmul.f32 1.4142135, %v189_v46 }
  0xb2   :  { %v119_v51 = vmul.f32 1.4142135, %v191_v49  ;;  %200 = vrsqrt.f32 %v94_v47 }
  0xb3   :  { %v137_v52 = vmul.f32 %v121_v50, %v297_v0  ;;  %202 = vrsqrt.f32 %v93_v48  ;;  %v74_v53 = vpop.xlane.xlu1 %73  ;;  %v72_v54 = vpop.xlane.xlu0 %71 }
  0xb4   :  { %v193_v55 = vpop.eup %192  ;;  %v135_v56 = vmul.f32 %v119_v51, %v299_v1  ;;  %v96_v57 = vmax.f32 %v74_v53, 1e-24  ;;  %v95_v58 = vmax.f32 %v72_v54, 1e-24 }
  0xb5   :  { %v195_v59 = vpop.eup %194  ;;  %153 = vst [vmem:[#allocation5 + $0x10] sm:$0xff] %v137_v52  ;;  %v122_v60 = vmul.f32 1.4142135, %v193_v55 }
  0xb6   :  { %151 = vst [vmem:[#allocation5] sm:$0xff] %v135_v56  ;;  %v120_v61 = vmul.f32 1.4142135, %v195_v59  ;;  %204 = vrsqrt.f32 %v96_v57 }
  0xb7   :  { %v138_v62 = vmul.f32 %v122_v60, %v301_v2  ;;  %206 = vrsqrt.f32 %v95_v58  ;;  %v78_v63 = vpop.xlane.xlu1 %77  ;;  %v76_v3 = vpop.xlane.xlu0 %75 }
  0xb8   :  { %v197_v0 = vpop.eup %196  ;;  %v136_v4 = vmul.f32 %v120_v61, %v307_v5  ;;  %v98_v6 = vmax.f32 %v78_v63, 1e-24  ;;  %v97_v7 = vmax.f32 %v76_v3, 1e-24 }
  0xb9   :  { %v199_v10 = vpop.eup %198  ;;  %154 = vst [vmem:[#allocation5 + $0x18] sm:$0xff] %v138_v62  ;;  %v124_v1 = vmul.f32 1.4142135, %v197_v0 }
  0xba   :  { %152 = vst [vmem:[#allocation5 + $0x8] sm:$0xff] %v136_v4  ;;  %v123_v11 = vmul.f32 1.4142135, %v199_v10  ;;  %208 = vrsqrt.f32 %v98_v6 }
  0xbb   :  { %v140_v14 = vmul.f32 %v124_v1, %v313_v8  ;;  %210 = vrsqrt.f32 %v97_v7  ;;  %v82_v15 = vpop.xlane.xlu1 %81  ;;  %v80_v18 = vpop.xlane.xlu0 %79 }
  0xbc   :  { %v201_v2 = vpop.eup %200  ;;  %v139_v19 = vmul.f32 %v123_v11, %v315_v9  ;;  %v100_v22 = vmax.f32 %v82_v15, 1e-24  ;;  %v99_v23 = vmax.f32 %v80_v18, 1e-24 }
  0xbd   :  { %v203_v26 = vpop.eup %202  ;;  %156 = vst [vmem:[#allocation5 + $0x28] sm:$0xff] %v140_v14  ;;  %v126_v5 = vmul.f32 1.4142135, %v201_v2 }
  0xbe   :  { %155 = vst [vmem:[#allocation5 + $0x20] sm:$0xff] %v139_v19  ;;  %v125_v27 = vmul.f32 1.4142135, %v203_v26  ;;  %212 = vrsqrt.f32 %v100_v22 }
  0xbf   :  { %v142_v30 = vmul.f32 %v126_v5, %v321_v12  ;;  %214 = vrsqrt.f32 %v99_v23  ;;  %v86_v31 = vpop.xlane.xlu1 %85  ;;  %v84_v32 = vpop.xlane.xlu0 %83 }
  0xc0   :  { %v205_v8 = vpop.eup %204  ;;  %v141_v33 = vmul.f32 %v125_v27, %v323_v13  ;;  %v102_v34 = vmax.f32 %v86_v31, 1e-24  ;;  %v101_v35 = vmax.f32 %v84_v32, 1e-24 }
  0xc1   :  { %v207_v36 = vpop.eup %206  ;;  %158 = vst [vmem:[#allocation5 + $0x38] sm:$0xff] %v142_v30  ;;  %v128_v9 = vmul.f32 1.4142135, %v205_v8 }
  0xc2   :  { %157 = vst [vmem:[#allocation5 + $0x30] sm:$0xff] %v141_v33  ;;  %v127_v37 = vmul.f32 1.4142135, %v207_v36  ;;  %216 = vrsqrt.f32 %v102_v34 }
  0xc3   :  { %v144_v38 = vmul.f32 %v128_v9, %v329_v16  ;;  %218 = vrsqrt.f32 %v101_v35 }
  0xc4   :  { %v209_v39 = vpop.eup %208  ;;  %v143_v12 = vmul.f32 %v127_v37, %v331_v17 }
  0xc5   :  { %v211_v40 = vpop.eup %210  ;;  %160 = vst [vmem:[#allocation5 + $0x48] sm:$0xff] %v144_v38  ;;  %v130_v41 = vmul.f32 1.4142135, %v209_v39 }
  0xc6   :  { %159 = vst [vmem:[#allocation5 + $0x40] sm:$0xff] %v143_v12  ;;  %v129_v42 = vmul.f32 1.4142135, %v211_v40 }
  0xc7   :  { %v146_v13 = vmul.f32 %v130_v41, %v337_v20 }
  0xc8   :  { %v213_v43 = vpop.eup %212  ;;  %v145_v44 = vmul.f32 %v129_v42, %v339_v21 }
  0xc9   :  { %v215_v45 = vpop.eup %214  ;;  %162 = vst [vmem:[#allocation5 + $0x58] sm:$0xff] %v146_v13  ;;  %v132_v46 = vmul.f32 1.4142135, %v213_v43 }
  0xca   :  { %161 = vst [vmem:[#allocation5 + $0x50] sm:$0xff] %v145_v44  ;;  %v131_v47 = vmul.f32 1.4142135, %v215_v45 }
  0xcb   :  { %v148_v16 = vmul.f32 %v132_v46, %v345_v24 }
  0xcc   :  { %v217_v48 = vpop.eup %216  ;;  %v147_v17 = vmul.f32 %v131_v47, %v347_v25 }
  0xcd   :  { %v219_v49 = vpop.eup %218  ;;  %164 = vst [vmem:[#allocation5 + $0x68] sm:$0xff] %v148_v16  ;;  %v134_v50 = vmul.f32 1.4142135, %v217_v48 }
  0xce   :  { %163 = vst [vmem:[#allocation5 + $0x60] sm:$0xff] %v147_v17  ;;  %v133_v20 = vmul.f32 1.4142135, %v219_v49 }
  0xcf   :  { %v150_v51 = vmul.f32 %v134_v50, %v353_v28 }
  0xd0   :  { %v149_v21 = vmul.f32 %v133_v20, %v355_v29 }
  0xd1   :  { %166 = vst [vmem:[#allocation5 + $0x78] sm:$0xff] %v150_v51 }
  0xd2   :  { %165 = vst [vmem:[#allocation5 + $0x70] sm:$0xff] %v149_v21 }
  0xd3   :  { %253 = shalt.err (!%p250_p12)
}
  0xd4   :  { %s254_s24 = scalar_lea.hbm %s393_s1, 2048 }
  0xd5   :  { %p255_p13 = scmp.ne.s32.totalorder %s393_s1, %s254_s24  ;;  %p258_p0 = scmp.lt.u32.totalorder %s254_s24, %s393_s1 }
  0xd7   :  { %p260_p1 = pnand %p258_p0, %p255_p13 }
  0xd9   :  { %263 = shalt.err (!%p260_p1)
}
  0xda   :  { %178 = dma.vmem_to_hbm [thread:$0]  %s173_s20, 2048, %s393_s1, [#allocation4], %s269_s16, %s269_s16, %s270_s17  }
  0xdb   :  { %266 = dma.done.wait [#allocation4], 2048  }
  0xdc   :  { %267 = vsyncadd [#allocation4], 4294965248 }
  0xdd   :  { %182 = vsyncpa [#allocation3], 1 }
  0xde   :  { %183 = vsyncpa [#allocation4], 1 }

</bundles_post_ra>
